<compile_context>
chip_gen: v7x
topology: tpu7x:2x2x1
jax: 0.10.0
libtpu: 0.0.40
codegen_flags: <defaults>
</compile_context>

<pallas_src>
import jax
import jax.numpy as jnp
from jax.experimental import pallas as pl
from jax.experimental.pallas import tpu as pltpu


LANE = 128
BF16_SUBLANE = 16   # a bf16 vreg holds [16, 128]


def _round_up(x: int, m: int) -> int:
    return ((x + m - 1) // m) * m


# ----------------------------------------------------------------------------
# Kernel
# ----------------------------------------------------------------------------
def critic_kernel(x_ref, w1_ref, b1_ref, w2_ref, b2_ref, wv_ref, bv_ref, v_ref):
    # x_ref:  (TB, IN)      f32  (raw state tile; cast to bf16 here on the VPU)
    # w1_ref: (IN, FC1_P)   bf16 ; b1_ref: (1, FC1_P) f32
    # w2_ref: (FC1_P, FC2_P) bf16 ; b2_ref: (1, FC2_P) f32
    # wv_ref: (FC2_P, 128)  bf16 (value-head weights in column 0, rest zero)
    # bv_ref: (1,)          f32  (SMEM scalar)
    x = x_ref[...].astype(jnp.bfloat16)

    # fc1 + relu  (MXU bf16, f32 accumulate; bias/ReLU in f32 on the VPU)
    h1 = jnp.dot(x, w1_ref[...], preferred_element_type=jnp.float32)
    h1 = jnp.maximum(h1 + b1_ref[...], 0.0)                       # (TB, FC1_P)

    # fc2 + relu
    h2 = jnp.dot(h1.astype(jnp.bfloat16), w2_ref[...],
                 preferred_element_type=jnp.float32)
    h2 = jnp.maximum(h2 + b2_ref[...], 0.0)                       # (TB, FC2_P)

    # value head on the MXU (no XLU lane reduce): only column 0 of wv is live,
    # so column 0 of the result is the value; other columns are exactly zero.
    vm = jnp.dot(h2.astype(jnp.bfloat16), wv_ref[...],
                 preferred_element_type=jnp.float32)              # (TB, 128)
    v_ref[...] = (vm[:, 0:1] + bv_ref[0]).astype(v_ref.dtype)     # (TB, 1)


# ----------------------------------------------------------------------------
# Wrapper
# ----------------------------------------------------------------------------
def _choose_tiling(B: int, max_tile: int):
    """Balanced, 16-aligned batch tiles with >=2 grid steps when B allows."""
    n_steps = 1 if B <= BF16_SUBLANE else max(2, pl.cdiv(B, max_tile))
    tb = _round_up(pl.cdiv(B, n_steps), BF16_SUBLANE)
    return tb, n_steps


def critic_forward(state, packed, *, max_tile=2048):
    """state: (B, input_dims) float32.  packed: output of pack_params()."""
    B, in_dims = state.shape
    assert packed["w1"].shape[0] == in_dims
    FC1_P = packed["w1"].shape[1]
    FC2_P = packed["w2"].shape[1]

    TB, n_steps = _choose_tiling(B, max_tile)
    B_pad = TB * n_steps

    # Row-only padding (no feature pad, no cast); usually a no-op.
    x = state if B_pad == B else jnp.pad(state, ((0, B_pad - B), (0, 0)))

    flops = 2 * B_pad * (in_dims * FC1_P + FC1_P * FC2_P + FC2_P * LANE)
    bytes_accessed = (
        B_pad * in_dims * 4                                           # f32 state
        + (packed["w1"].size + packed["w2"].size + packed["wv"].size) * 2  # bf16 weights
        + (packed["b1"].size + packed["b2"].size + packed["bv"].size) * 4  # f32 biases
        + B_pad * 4                                                   # f32 output
    )

    out = pl.pallas_call(
        critic_kernel,
        out_shape=jax.ShapeDtypeStruct((B_pad, 1), jnp.float32),
        grid=(n_steps,),
        in_specs=[
            pl.BlockSpec((TB, in_dims), lambda i: (i, 0)),      # state tile (pipelined)
            pl.BlockSpec((in_dims, FC1_P), lambda i: (0, 0)),   # w1  (VMEM-resident)
            pl.BlockSpec((1, FC1_P), lambda i: (0, 0)),         # b1
            pl.BlockSpec((FC1_P, FC2_P), lambda i: (0, 0)),     # w2
            pl.BlockSpec((1, FC2_P), lambda i: (0, 0)),         # b2
            pl.BlockSpec((FC2_P, LANE), lambda i: (0, 0)),      # wv (col 0 live)
            pl.BlockSpec(memory_space=pltpu.MemorySpace.SMEM),  # bv scalar
        ],
        out_specs=pl.BlockSpec((TB, 1), lambda i: (i, 0)),
        compiler_params=pltpu.CompilerParams(
            dimension_semantics=("parallel",),
            vmem_limit_bytes=32 * 1024 * 1024),
        cost_estimate=pl.CostEstimate(
            flops=flops, transcendentals=0, bytes_accessed=bytes_accessed),
    )(x, packed["w1"], packed["b1"], packed["w2"], packed["b2"],
      packed["wv"], packed["bv"])

    return out[:B]


# ----------------------------------------------------------------------------
# Parameter init (logical shapes) and kernel-layout packing (padded / bf16)
# ----------------------------------------------------------------------------
def init_params(key, input_dims, fc1_dims, fc2_dims):
    """Logical params, kernel-friendly (in, out) layout, torch-default init."""
    ks = jax.random.split(key, 6)

    def linear(kw, kb, fan_in, fan_out):
        bound = 1.0 / jnp.sqrt(fan_in)
        w = jax.random.uniform(kw, (fan_in, fan_out), jnp.float32, -bound, bound)
        b = jax.random.uniform(kb, (1, fan_out), jnp.float32, -bound, bound)
        return w, b

    w1, b1 = linear(ks[0], ks[1], input_dims, fc1_dims)
    w2, b2 = linear(ks[2], ks[3], fc1_dims, fc2_dims)
    wv, bv = linear(ks[4], ks[5], fc2_dims, 1)
    return {"w1": w1, "b1": b1, "w2": w2, "b2": b2, "wv": wv, "bv": bv}


def pack_params(params):
    """Zero-pad hidden dims to multiples of 128, cast matmul weights to bf16.

    w1 keeps its true K = input_dims (the state is passed raw); wv becomes a
    (FC2_P, 128) bf16 MXU operand with only column 0 non-zero.
    """
    in_dims, fc1 = params["w1"].shape
    fc2 = params["w2"].shape[1]
    FC1_P, FC2_P = _round_up(fc1, LANE), _round_up(fc2, LANE)

    def pad2(a, r, c):
        return jnp.pad(a, ((0, r - a.shape[0]), (0, c - a.shape[1])))

    return {
        "w1": pad2(params["w1"], in_dims, FC1_P).astype(jnp.bfloat16),
        "b1": pad2(params["b1"], 1, FC1_P),                       # f32
        "w2": pad2(params["w2"], FC1_P, FC2_P).astype(jnp.bfloat16),
        "b2": pad2(params["b2"], 1, FC2_P),                       # f32
        "wv": pad2(params["wv"], FC2_P, LANE).astype(jnp.bfloat16),
        "bv": params["bv"].reshape(-1),                           # (1,) f32 -> SMEM
    }


# ----------------------------------------------------------------------------
# Reference (same bf16 matmul operands / f32 accumulate as the kernel)
# ----------------------------------------------------------------------------
def reference_bf16(state, params):
    xb = state.astype(jnp.bfloat16)
    w1 = params["w1"].astype(jnp.bfloat16)
    w2 = params["w2"].astype(jnp.bfloat16)
    wv = params["wv"].astype(jnp.bfloat16)
    h1 = jnp.maximum(
        jnp.dot(xb, w1, preferred_element_type=jnp.float32) + params["b1"], 0.0)
    h2 = jnp.maximum(
        jnp.dot(h1.astype(jnp.bfloat16), w2,
                preferred_element_type=jnp.float32) + params["b2"], 0.0)
    return jnp.dot(h2.astype(jnp.bfloat16), wv,
                   preferred_element_type=jnp.float32) + params["bv"]


# ----------------------------------------------------------------------------
# Demo + correctness check
# ----------------------------------------------------------------------------
if __name__ == "__main__":
    # Small shapes consistent with the module's forward (state: (batch, input_dims)).
    batch, input_dims, fc1_dims, fc2_dims = 64, 32, 64, 32

    key = jax.random.PRNGKey(0)
    k_state, k_params = jax.random.split(key)
    state = jax.random.normal(k_state, (batch, input_dims), dtype=jnp.float32)

    params = init_params(k_params, input_dims, fc1_dims, fc2_dims)
    packed = pack_params(params)

    v = critic_forward(state, packed)
    jax.block_until_ready(v)

    v_ref = reference_bf16(state, params)
    assert v.shape == (batch, 1)
    assert jnp.allclose(v, v_ref, atol=2e-3, rtol=2e-3), (
        float(jnp.max(jnp.abs(v - v_ref))))

    # TODO(synk): Adam optimizer / checkpoint save-load / device placement from the
    # PyTorch module are training utilities, not forward compute, and are not ported.
    print("KERNEL_OK")
</pallas_src>

<mosaic_0001>
module attributes {stable_mosaic.version = 11 : i64} {
  func.func @critic_kernel(%arg0: i32, %arg1: memref<32x32xf32, #tpu.memory_space<vmem>>, %arg2: memref<32x128xbf16, #tpu.memory_space<vmem>>, %arg3: memref<1x128xf32, #tpu.memory_space<vmem>>, %arg4: memref<128x128xbf16, #tpu.memory_space<vmem>>, %arg5: memref<1x128xf32, #tpu.memory_space<vmem>>, %arg6: memref<128x128xbf16, #tpu.memory_space<vmem>>, %arg7: memref<1xf32, #tpu.memory_space<smem>>, %arg8: memref<32x1xf32, #tpu.memory_space<vmem>>) attributes {dimension_semantics = [#tpu.dimension_semantics<parallel>], iteration_bounds = array<i64: 2>, scalar_prefetch = 0 : i64, scratch_operands = 0 : i64, tpu.core_type = #tpu.core_type<tc>, window_params = [{transform_indices = @transform_0, window_bounds = array<i64: 32, 32>}, {pipeline_mode = #tpu.pipeline_mode<synchronous>, transform_indices = @transform_1, window_bounds = array<i64: 32, 128>}, {pipeline_mode = #tpu.pipeline_mode<synchronous>, transform_indices = @transform_2, window_bounds = array<i64: 1, 128>}, {pipeline_mode = #tpu.pipeline_mode<synchronous>, transform_indices = @transform_3, window_bounds = array<i64: 128, 128>}, {pipeline_mode = #tpu.pipeline_mode<synchronous>, transform_indices = @transform_4, window_bounds = array<i64: 1, 128>}, {pipeline_mode = #tpu.pipeline_mode<synchronous>, transform_indices = @transform_5, window_bounds = array<i64: 128, 128>}, {transform_indices = @transform_6, window_bounds = array<i64: 1>}, {transform_indices = @transform_7, window_bounds = array<i64: 32, 1>}]} {
    %c0 = arith.constant 0 : index
    %c0_0 = arith.constant 0 : index
    %0 = vector.load %arg1[%c0, %c0_0] : memref<32x32xf32, #tpu.memory_space<vmem>>, vector<32x32xf32>
    %1 = arith.truncf %0 : vector<32x32xf32> to vector<32x32xbf16>
    %c0_1 = arith.constant 0 : index
    %c0_2 = arith.constant 0 : index
    %2 = vector.load %arg2[%c0_1, %c0_2] : memref<32x128xbf16, #tpu.memory_space<vmem>>, vector<32x128xbf16>
    %cst = arith.constant dense<0.000000e+00> : vector<32x128xf32>
    %3 = tpu.matmul %1, %2, %cst {dimension_numbers = #tpu.dot_dimension_numbers<[1], [0], [0], [1], [0, 0, 1, 1], [], []>} : vector<32x32xbf16>, vector<32x128xbf16>, vector<32x128xf32> -> vector<32x128xf32>
    %c0_3 = arith.constant 0 : index
    %c0_4 = arith.constant 0 : index
    %4 = vector.load %arg3[%c0_3, %c0_4] : memref<1x128xf32, #tpu.memory_space<vmem>>, vector<1x128xf32>
    %5 = vector.broadcast %4 : vector<1x128xf32> to vector<32x128xf32>
    %6 = arith.addf %3, %5 : vector<32x128xf32>
    %cst_5 = arith.constant 0.000000e+00 : f32
    %7 = vector.broadcast %cst_5 : f32 to vector<32x128xf32>
    %8 = arith.maximumf %6, %7 : vector<32x128xf32>
    %9 = arith.truncf %8 : vector<32x128xf32> to vector<32x128xbf16>
    %c0_6 = arith.constant 0 : index
    %c0_7 = arith.constant 0 : index
    %10 = vector.load %arg4[%c0_6, %c0_7] : memref<128x128xbf16, #tpu.memory_space<vmem>>, vector<128x128xbf16>
    %cst_8 = arith.constant dense<0.000000e+00> : vector<32x128xf32>
    %11 = tpu.matmul %9, %10, %cst_8 {dimension_numbers = #tpu.dot_dimension_numbers<[1], [0], [0], [1], [0, 0, 1, 1], [], []>} : vector<32x128xbf16>, vector<128x128xbf16>, vector<32x128xf32> -> vector<32x128xf32>
    %c0_9 = arith.constant 0 : index
    %c0_10 = arith.constant 0 : index
    %12 = vector.load %arg5[%c0_9, %c0_10] : memref<1x128xf32, #tpu.memory_space<vmem>>, vector<1x128xf32>
    %13 = vector.broadcast %12 : vector<1x128xf32> to vector<32x128xf32>
    %14 = arith.addf %11, %13 : vector<32x128xf32>
    %cst_11 = arith.constant 0.000000e+00 : f32
    %15 = vector.broadcast %cst_11 : f32 to vector<32x128xf32>
    %16 = arith.maximumf %14, %15 : vector<32x128xf32>
    %17 = arith.truncf %16 : vector<32x128xf32> to vector<32x128xbf16>
    %c0_12 = arith.constant 0 : index
    %c0_13 = arith.constant 0 : index
    %18 = vector.load %arg6[%c0_12, %c0_13] : memref<128x128xbf16, #tpu.memory_space<vmem>>, vector<128x128xbf16>
    %cst_14 = arith.constant dense<0.000000e+00> : vector<32x128xf32>
    %19 = tpu.matmul %17, %18, %cst_14 {dimension_numbers = #tpu.dot_dimension_numbers<[1], [0], [0], [1], [0, 0, 1, 1], [], []>} : vector<32x128xbf16>, vector<128x128xbf16>, vector<32x128xf32> -> vector<32x128xf32>
    %20 = vector.extract_strided_slice %19 {offsets = [0, 0], sizes = [32, 1], strides = [1, 1]} : vector<32x128xf32> to vector<32x1xf32>
    %c0_15 = arith.constant 0 : index
    %21 = memref.load %arg7[%c0_15] : memref<1xf32, #tpu.memory_space<smem>>
    %22 = vector.broadcast %21 : f32 to vector<32x1xf32>
    %23 = arith.addf %20, %22 : vector<32x1xf32>
    %c0_16 = arith.constant 0 : index
    %c0_17 = arith.constant 0 : index
    %24 = vector.load %arg8[%c0_16, %c0_17] : memref<32x1xf32, #tpu.memory_space<vmem>>, vector<32x1xf32>
    tpu.vector_store %arg8[%c0_16, %c0_17], %23 {strides = array<i32>} : memref<32x1xf32, #tpu.memory_space<vmem>>, vector<32x1xf32>,
    return
  }
  func.func @transform_0(%arg0: i32) -> (i32, i32) {
    %c0_i32 = arith.constant 0 : i32
    %c0_i32_0 = arith.constant 0 : i32
    return %arg0, %c0_i32 : i32, i32
  }
  func.func @transform_1(%arg0: i32) -> (i32, i32) {
    %c0_i32 = arith.constant 0 : i32
    %c0_i32_0 = arith.constant 0 : i32
    %c0_i32_1 = arith.constant 0 : i32
    return %c0_i32, %c0_i32_0 : i32, i32
  }
  func.func @transform_2(%arg0: i32) -> (i32, i32) {
    %c0_i32 = arith.constant 0 : i32
    %c0_i32_0 = arith.constant 0 : i32
    %c0_i32_1 = arith.constant 0 : i32
    return %c0_i32, %c0_i32_0 : i32, i32
  }
  func.func @transform_3(%arg0: i32) -> (i32, i32) {
    %c0_i32 = arith.constant 0 : i32
    %c0_i32_0 = arith.constant 0 : i32
    %c0_i32_1 = arith.constant 0 : i32
    return %c0_i32, %c0_i32_0 : i32, i32
  }
  func.func @transform_4(%arg0: i32) -> (i32, i32) {
    %c0_i32 = arith.constant 0 : i32
    %c0_i32_0 = arith.constant 0 : i32
    %c0_i32_1 = arith.constant 0 : i32
    return %c0_i32, %c0_i32_0 : i32, i32
  }
  func.func @transform_5(%arg0: i32) -> (i32, i32) {
    %c0_i32 = arith.constant 0 : i32
    %c0_i32_0 = arith.constant 0 : i32
    %c0_i32_1 = arith.constant 0 : i32
    return %c0_i32, %c0_i32_0 : i32, i32
  }
  func.func @transform_6(%arg0: i32) -> i32 {
    %c0_i32 = arith.constant 0 : i32
    %c0_i32_0 = arith.constant 0 : i32
    return %c0_i32 : i32
  }
  func.func @transform_7(%arg0: i32) -> (i32, i32) {
    %c0_i32 = arith.constant 0 : i32
    %c0_i32_0 = arith.constant 0 : i32
    return %arg0, %c0_i32 : i32, i32
  }
}

</mosaic_0001>

<bundles_post_ra>
// kernel: tpu_custom_call.1
= control target key start
LH: loop header
LB: loop body
LE: loop exit
PB: predicated region body
PF: predicated region fallthrough
CT: control target
= control target key end

     0   :  { %s1042_s0 = inlined_call_operand.vmem [shape: f32[64,32], index: 0, kind: input, shape index: {}]   ;;  %s1043_s1 = inlined_call_operand.vmem [shape: bf16[32,128], index: 1, kind: input, shape index: {}]   ;;  %s1044_s2 = inlined_call_operand.vmem [shape: f32[1,128], index: 2, kind: input, shape index: {}]   ;;  %s1045_s3 = inlined_call_operand.vmem [shape: bf16[128,128], index: 3, kind: input, shape index: {}]   ;;  %s1046_s4 = inlined_call_operand.vmem [shape: f32[1,128], index: 4, kind: input, shape index: {}]   ;;  %s1047_s5 = inlined_call_operand.hbm [shape: bf16[128,128], index: 5, kind: input, shape index: {}]   ;;  %s1048_s6 = inlined_call_operand.<no memory space> [shape: f32[1], index: 6, kind: input, shape index: {}]   ;;  %s1049_s7 = inlined_call_operand.vmem [shape: f32[64,1], index: 7, kind: output, shape index: {}]  }
   0x1   :  { %12 = sst [smem:[#allocation2]] %s1048_s6 }
   0x2   :  { %13 = vsyncpa [#allocation4], 0  ;;  %s940_s26 = smov 0  }
   0x3 LB: > { %s708_s27 = sadd.s32 4294967295, %s892_s26   ;;  %p710_p0 = scmp.ge.s32.totalorder %s892_s26, 1  ;;  %s892_s26 = sphi %s940_s26, %s19_s26  }
   0x4   : > { %p202_p1 = scmp.lt.s32.totalorder %s892_s26, 3  ;;  %s894_s28 = smov [#allocation3]  }
   0x5   : > { %s226_s29 = sshll.u32 %s894_s28, 4  ;;  %p954_p3 = scmp.eq.s32.totalorder %s708_s27, 0  ;;  %s227_s29 = int_to_ptr.vmem [resolvable:$true] %s226_s29 }
   0x6   : > { %p948_p2 = pnand %p710_p0, %p202_p1  ;;  %s854_s11 = scalar_lea.hbm %s1047_s5, 1024 }
   0x7   : > { %s1054_s6 = scalar_select %p954_p3, 1, 0 }
   0x8   : > { %s1053_s30 = scalar_select %p948_p2, 1, 0 }
   0x9   : > { %p819_p4 = pneg %p948_p2  ;;  %p855_p6 = scmp.ne.s32.totalorder %s1047_s5, %s854_s11 }
   0xa   : > { %p861_p10 = scmp.lt.u32.totalorder %s854_s11, %s1047_s5 }
   0xb   : > { %p962_p5 = pnand %p954_p3, %p819_p4 }
   0xd   : > { %p856_p7 = pneg %p962_p5 }
   0xf   : > { %p857_p8 = pnand %p856_p7, %p855_p6 }
  0x11   : > { %p858_p9 = pneg %p857_p8 }
  0x13   : > { %p863_p11 = pnand %p861_p10, %p858_p9 }
  0x15   : > { %866 = shalt.err (!%p863_p11)
}
  0x16   : > { %s867_s16 = scalar_lea.vmem %s227_s29, 1024  ;;  %p875_p1 = scmp.lt.s32.totalorder %s227_s29, %s227_s29 }
  0x17   : > { %p868_p12 = scmp.ne.s32.totalorder %s227_s29, %s867_s16  ;;  %p876_p4 = scmp.lt.s32.totalorder %s867_s16, %s867_s16 }
  0x19   : > { %p870_p13 = pnand %p868_p12, %p856_p7  ;;  %p877_p3 = por %p876_p4, %p875_p1 }
  0x1b   : > { %p871_p0 = pneg %p870_p13 }
  0x1d   : > { %p878_p2 = pnand %p877_p3, %p871_p0 }
  0x1f   : > { %881 = shalt.err (!%p878_p2)
}
  0x20   : > { %s895_s17 = smov 64   ;;  %s896_s18 = smov 4  }
  0x21   : > { %822 = dma.hbm_to_vmem [thread:$0]  (!%p962_p5), %s1047_s5, 1024, %s227_s29, [#allocation4], %s895_s17, %s895_s17, %s896_s18  }
  0x22   : > { %p1056_p6 = scmp.ne.s32.totalorder %s1053_s30, 0 }
  0x23   : > { %p1057_p8 = scmp.ne.s32.totalorder (!%p1056_p6), %s1054_s6, 0 }
  0x24   : > { %254 = sbr.rel (%p1056_p6) target bundleno = 716 (0x2cc), region = 48 }
  0x2b   : > { %887 = dma.done.wait (%p1057_p8), [#allocation4], 1024  }
  0x2c   : > { %889 = vsyncadd (%p1057_p8), [#allocation4], 4294966272  ;;  %s715_s21 = sshll.u32 %s708_s27, 2  ;;  %v836_v0 = vld [vmem:[%s1043_s1] sm:$0xff]   ;;  %v837_v1 = vld [vmem:[%s1043_s1 + $0x8] sm:$0xff]   ;;  %vm328_vm0 = vcmask 261120  }
  0x2d   : > { %p287_p2 = scmp.lt.s32.totalorder %s715_s21, 7  ;;  %767 = vmatprep.subr.bf16.mxu0 %v836_v0  ;;  %v838_v7 = vld [vmem:[%s1045_s3] sm:$0xff]   ;;  %v839_v8 = vld [vmem:[%s1045_s3 + $0x8] sm:$0xff]   ;;  %v840_v10 = vld [vmem:[%s1045_s3 + $0x10] sm:$0xff]   ;;  %s629_s6 = sld [smem:[#allocation2]]  ;;  %vm635_vm1 = vcmask 7168  }
  0x2e   : > { %768 = vmatpush3.bf16.msra.mxu0 %v836_v0  ;;  %775 = vmatprep.subr.bf16.mxu1 %v838_v7  ;;  %v841_v11 = vld [vmem:[%s1045_s3 + $0x18] sm:$0xff]   ;;  %v842_v12 = vld [vmem:[%s1045_s3 + $0x20] sm:$0xff]   ;;  %v843_v13 = vld [vmem:[%s1045_s3 + $0x28] sm:$0xff]  }
  0x2f   : > { %s1059_s21 = smov (!%p287_p2, %s715_s21), 7  ;;  %769 = vmatprep.subr.bf16.mxu0 %v837_v1  ;;  %776 = vmatpush3.bf16.msra.mxu1 %v838_v7  ;;  %v844_v14 = vld [vmem:[%s1045_s3 + $0x30] sm:$0xff]   ;;  %v845_v15 = vld [vmem:[%s1045_s3 + $0x38] sm:$0xff]   ;;  %v846_v16 = vld [vmem:[#allocation3] sm:$0xff]  }
  0x30   : > { %s716_s22 = sshll.u32 %s1059_s21, 3  ;;  %777 = vmatprep.subr.bf16.mxu1 %v839_v8  ;;  %v847_v17 = vld [vmem:[#allocation3 + $0x8] sm:$0xff]   ;;  %v848_v18 = vld [vmem:[#allocation3 + $0x10] sm:$0xff]   ;;  %v849_v19 = vld [vmem:[#allocation3 + $0x18] sm:$0xff]  }
  0x31   : > { %s290_s25 = scalar_lea.vmem %s1042_s0, %s716_s22  ;;  %v850_v20 = vld [vmem:[#allocation3 + $0x20] sm:$0xff]   ;;  %v851_v21 = vld [vmem:[#allocation3 + $0x28] sm:$0xff]   ;;  %v852_v37 = vld [vmem:[#allocation3 + $0x30] sm:$0xff]   ;;  %s296_s9 = scalar_lea.vmem %s1049_s7, %s716_s22 }
  0x32   : > { %v299_v2 = vld [vmem:[%s290_s25] sm:$0xff]  ;;  %v300_v3 = vld [vmem:[%s290_s25 + $0x8] sm:$0xff]  ;;  %v301_v4 = vld [vmem:[%s290_s25 + $0x10] sm:$0xff]  ;;  %770 = vmatpush3.bf16.msra.mxu0 %v837_v1 }
  0x33   : > { %v303_v5 = vpack.c.bf16 %v300_v3, %v299_v2  ;;  %v302_v6 = vld [vmem:[%s290_s25 + $0x18] sm:$0xff]  ;;  %778 = vmatpush3.bf16.msra.mxu1 %v839_v8  ;;  %795 = vmatprep.subr.bf16.mxu0 %v846_v16  ;;  %v719_v22 = vld [vmem:[%s1044_s2] ss:$0 sm:$0xff]  ;;  %v630_v54 = vstv %s629_s6 }
  0x34   : > { %v304_v9 = vpack.c.bf16 %v302_v6, %v301_v4  ;;  %779 = vmatprep.subr.bf16.mxu1 %v840_v10  ;;  %v853_v38 = vld [vmem:[#allocation3 + $0x38] sm:$0xff]   ;;  %v724_v39 = vld [vmem:[%s1046_s4] ss:$0 sm:$0xff] }
  0x35   : > { %771 = vmatprep.mubr.msk.bf16.mxu0 %vm328_vm0, %v303_v5 }
  0x36   : > { %772 = vmatmul.mubr.msk.bf16.vlgmr.msra.gmra.mrb[0].mxu0 %vm328_vm0, %v304_v9 }
  0x37   : > { %780 = vmatpush3.bf16.msra.mxu1 %v840_v10  ;;  %796 = vmatpush3.bf16.msra.mxu0 %v846_v16 }
  0x38   : > { %781 = vmatprep.subr.bf16.mxu1 %v841_v11  ;;  %797 = vmatprep.subr.bf16.mxu0 %v847_v17 }
  0x3b   : > { %782 = vmatpush3.bf16.msra.mxu1 %v841_v11  ;;  %798 = vmatpush3.bf16.msra.mxu0 %v847_v17 }
  0x3c   : > { %783 = vmatprep.subr.bf16.mxu1 %v842_v12  ;;  %799 = vmatprep.subr.bf16.mxu0 %v848_v18 }
  0x3f   : > { %784 = vmatpush3.bf16.msra.mxu1 %v842_v12  ;;  %800 = vmatpush3.bf16.msra.mxu0 %v848_v18 }
  0x40   : > { %785 = vmatprep.subr.bf16.mxu1 %v843_v13  ;;  %801 = vmatprep.subr.bf16.mxu0 %v849_v19 }
  0x43   : > { %786 = vmatpush3.bf16.msra.mxu1 %v843_v13  ;;  %802 = vmatpush3.bf16.msra.mxu0 %v849_v19 }
  0x44   : > { %787 = vmatprep.subr.bf16.mxu1 %v844_v14  ;;  %803 = vmatprep.subr.bf16.mxu0 %v850_v20 }
  0x47   : > { %788 = vmatpush3.bf16.msra.mxu1 %v844_v14  ;;  %804 = vmatpush3.bf16.msra.mxu0 %v850_v20 }
  0x48   : > { %789 = vmatprep.subr.bf16.mxu1 %v845_v15  ;;  %805 = vmatprep.subr.bf16.mxu0 %v851_v21 }
  0x4b   : > { %790 = vmatpush3.bf16.msra.mxu1 %v845_v15  ;;  %806 = vmatpush3.bf16.msra.mxu0 %v851_v21 }
  0x4c   : > { %807 = vmatprep.subr.bf16.mxu0 %v852_v37 }
  0x4f   : > { %808 = vmatpush3.bf16.msra.mxu0 %v852_v37 }
  0x50   : > { %809 = vmatprep.subr.bf16.mxu0 %v853_v38 }
  0x53   : > { %810 = vmatpush3.bf16.msra.mxu0 %v853_v38 }
 0x109   : > { %v773_v23 = vpop.f32.mrb[0].mxu0 }
 0x10a   : > { %v378_v24 = vadd.f32 %v773_v23, %v719_v22  ;;  %v369_v25 = vpop.f32.mrb[1].mxu0 }
 0x10b   : > { %v370_v26 = vadd.f32 %v719_v22, %v369_v25  ;;  %v774_v27 = vpop.f32.mrb[2].mxu0 }
 0x10c   : > { %v381_v28 = vadd.f32 %v774_v27, %v719_v22  ;;  %v372_v29 = vpop.f32.mrb[3].mxu0  ;;  %v386_v31 = vmax.f32 %v378_v24, 0.0 }
 0x10d   : > { %v373_v30 = vadd.f32 %v719_v22, %v372_v29  ;;  %v384_v33 = vmax.f32 %v370_v26, 0.0 }
 0x10e   : > { %v387_v32 = vmax.f32 %v381_v28, 0.0 }
 0x10f   : > { %v385_v34 = vmax.f32 %v373_v30, 0.0 }
 0x110   : > { %v389_v35 = vpack.c.bf16 %v387_v32, %v386_v31 }
 0x111   : > { %v388_v36 = vpack.c.bf16 %v385_v34, %v384_v33 }
 0x113   : > { %791 = vmatprep.mubr.bf16.mxu1 %v388_v36 }
 0x114   : > { %792 = vmatmul.mubr.bf16.vlgmr.msra.gmra.mrb[0].mxu1 %v389_v35 }
 0x1e7   : > { %v793_v40 = vpop.f32.mrb[0].mxu1 }
 0x1e8   : > { %v504_v41 = vadd.f32 %v793_v40, %v724_v39  ;;  %v495_v42 = vpop.f32.mrb[1].mxu1 }
 0x1e9   : > { %v496_v43 = vadd.f32 %v724_v39, %v495_v42  ;;  %v794_v44 = vpop.f32.mrb[2].mxu1 }
 0x1ea   : > { %v507_v45 = vadd.f32 %v794_v44, %v724_v39  ;;  %v498_v46 = vpop.f32.mrb[3].mxu1  ;;  %v512_v48 = vmax.f32 %v504_v41, 0.0 }
 0x1eb   : > { %v499_v47 = vadd.f32 %v724_v39, %v498_v46  ;;  %v510_v50 = vmax.f32 %v496_v43, 0.0 }
 0x1ec   : > { %v513_v49 = vmax.f32 %v507_v45, 0.0 }
 0x1ed   : > { %v511_v51 = vmax.f32 %v499_v47, 0.0 }
 0x1ee   : > { %v515_v52 = vpack.c.bf16 %v513_v49, %v512_v48 }
 0x1ef   : > { %v514_v53 = vpack.c.bf16 %v511_v51, %v510_v50 }
 0x1f1   : > { %811 = vmatprep.mubr.bf16.mxu0 %v514_v53 }
 0x1f2   : > { %812 = vmatmul.mubr.bf16.vlgmr.msra.gmra.mrb[4].mxu0 %v515_v52 }
 0x2c5   : > { %v813_v55 = vpop.f32.mrb[4].mxu0 }
 0x2c6   : > { %v614_v56 = vpop.f32.mrb[5].mxu0  ;;  %v633_v61 = vadd.f32 %v813_v55, %v630_v54 }
 0x2c7   : > { %v631_v57 = vadd.f32 %v630_v54, %v614_v56  ;;  %v814_v58 = vpop.f32.mrb[6].mxu0 }
 0x2c8   : > { %v617_v59 = vpop.f32.mrb[7].mxu0  ;;  %v634_v62 = vadd.f32 %v814_v58, %v630_v54  ;;  %638 = vst.msk [vmem:[%s296_s9 + $0x10] sm:$0xff] %vm635_vm1, %v633_v61 }
 0x2c9   : > { %636 = vst.msk [vmem:[%s296_s9] sm:$0xff] %vm635_vm1, %v631_v57  ;;  %v632_v60 = vadd.f32 %v630_v54, %v617_v59 }
 0x2ca   : > { %639 = vst.msk [vmem:[%s296_s9 + $0x18] sm:$0xff] %vm635_vm1, %v634_v62 }
 0x2cb   : > { %637 = vst.msk [vmem:[%s296_s9 + $0x8] sm:$0xff] %vm635_vm1, %v632_v60 }
 0x2cc PF: > { %s19_s26 = sadd.s32 1, %s892_s26  }
 0x2cd   : > { %p16_p3 = scmp.ge.s32.totalorder %s19_s26, 4  }
 0x2cf   :  { %18 = sbr.rel (!%p16_p3) target bundleno = 3 (0x3), region = 83 }
 0x2d6   :  { %662 = vsyncpa [#allocation4], 1 }
 0x2d7   :  { %664 = vsyncpa [#allocation4 + $0x1], 1 }

</bundles_post_ra>
